<compile_context>
chip_gen: v6e
topology: v6e:2x2x1
jax: 0.10.0
libtpu: 0.0.40
codegen_flags: <defaults>
</compile_context>

<pallas_src>
import jax
import jax.numpy as jnp
from jax import lax
from jax.experimental import pallas as pl
from jax.experimental.pallas import tpu as pltpu

EPS = 1e-5


# ------------------------------ Pallas kernel ------------------------------

def fused_cnn_kernel(p_ref, w_ref, shift_ref, w1_ref, b1_ref, w2_ref, b2_ref, o_ref):
    """Fused conv(5x5,p=2)+BN(eval)+ReLU+MaxPool(2,2)+Linear(1536,128)+Linear(128,10 pad 128).

    p_ref:     (B, 75, 1024) bf16  im2col patches; row k = (kh*5+kw)*3+ci,
                                    col = (hh*2+ww)*256 + ph*16+pw
    w_ref:     (6, 75)       bf16  BN-folded conv weight
    shift_ref: (6, 1)        f32   BN-folded conv bias/shift
    w1_ref:    (6, 256, 128) bf16  f1 weight, reshaped to (C, H*W, 128)
    b1_ref:    (1, 128)      f32   f1 bias
    w2_ref:    (128, 128)    bf16  f2 weight, zero-padded from (128, 10)
    b2_ref:    (1, 128)      f32   f2 bias, zero-padded from (1, 10)
    o_ref:     (B, 1, 128)   f32   logits (first 10 lanes valid)
    """
    B = p_ref.shape[0]
    w = w_ref[...]                      # (6, 75)
    shift = shift_ref[...]              # (6, 1)
    b1 = b1_ref[...]                    # (1, 128)
    w2 = w2_ref[...]                    # (128, 128)
    b2 = b2_ref[...]                    # (1, 128)

    for b in range(B):                  # static unroll over the images of this block
        # conv as one MXU matmul, spatial on lanes
        z = jnp.dot(w, p_ref[b], preferred_element_type=jnp.float32)       # (6, 1024)
        a = jnp.maximum(z + shift, 0.0)                                     # BN + ReLU
        # 2x2 max-pool == max over the four pool-offset column slabs
        pooled = jnp.maximum(jnp.maximum(a[:, 0:256], a[:, 256:512]),
                             jnp.maximum(a[:, 512:768], a[:, 768:1024]))    # (6, 256)
        # d1 dropout = identity (eval)
        pooled = pooled.astype(jnp.bfloat16)

        # f1: contract over (channel, pooled-spatial) == PyTorch flatten order c*256+s
        h = b1                                                              # (1, 128) f32
        for c in range(6):
            h = h + jnp.dot(pooled[c:c + 1, :], w1_ref[c],
                            preferred_element_type=jnp.float32)             # (1, 128)
        # d2 dropout = identity (eval)
        y = jnp.dot(h.astype(jnp.bfloat16), w2,
                    preferred_element_type=jnp.float32) + b2                # (1, 128)
        o_ref[b] = y


# --------------------------------- wrapper ---------------------------------

def _pick_block(n):
    """Largest B in {8,4,2,1} dividing n, preferring grid >= 2 steps (v7x megacore)."""
    for b in (8, 4, 2, 1):
        if n % b == 0 and n // b >= 2:
            return b
    for b in (8, 4, 2, 1):
        if n % b == 0:
            return b
    return 1


def _build_patches(x_nchw):
    """NCHW f32 -> pool-grouped, lane-dense im2col patches (N, 75, 1024) in bf16."""
    x = jnp.transpose(x_nchw, (0, 2, 3, 1)).astype(jnp.bfloat16)   # (N, 32, 32, 3)
    n = x.shape[0]
    xp = jnp.pad(x, ((0, 0), (2, 2), (2, 2), (0, 0)))              # (N, 36, 36, 3)
    blocks = []
    for hh in range(2):
        for ww in range(2):
            taps = []
            for kh in range(5):
                for kw in range(5):
                    taps.append(xp[:, hh + kh:hh + kh + 31:2,
                                   ww + kw:ww + kw + 31:2, :])     # (N, 16, 16, 3)
            g = jnp.stack(taps, axis=1)                            # (N, 25, 16, 16, 3)
            g = jnp.transpose(g, (0, 1, 4, 2, 3))                  # (N, 25, 3, 16, 16)
            blocks.append(g.reshape(n, 75, 256))
    return jnp.concatenate(blocks, axis=2)                         # (N, 75, 1024)


def baseline_forward(x, params):
    n = x.shape[0]
    patches = _build_patches(x)                                    # (n, 75, 1024) bf16

    # Fold eval-mode BatchNorm into the conv weight / bias.
    scale = params["gamma"] / jnp.sqrt(params["var"] + EPS)                  # (6,)
    shift = (params["beta"] + (params["bc"] - params["mean"]) * scale)       # (6,)
    shift = shift.reshape(6, 1).astype(jnp.float32)
    wmat = jnp.transpose(params["Wc"], (0, 2, 3, 1)).reshape(6, 75)          # (co, kh, kw, ci)
    wfold = (wmat * scale[:, None]).astype(jnp.bfloat16)                     # (6, 75)

    w1r = params["W1"].reshape(6, 256, 128).astype(jnp.bfloat16)             # (C, H*W, 128)
    b1 = params["b1"].astype(jnp.float32)                                    # (1, 128)
    w2p = jnp.pad(params["W2"], ((0, 0), (0, 128 - params["W2"].shape[1]))
                  ).astype(jnp.bfloat16)                                     # (128, 128)
    b2p = jnp.pad(params["b2"], ((0, 0), (0, 128 - params["b2"].shape[1]))
                  ).astype(jnp.float32)                                      # (1, 128)

    B = _pick_block(n)
    out = pl.pallas_call(
        fused_cnn_kernel,
        out_shape=jax.ShapeDtypeStruct((n, 1, 128), jnp.float32),
        grid=(n // B,),
        in_specs=[
            pl.BlockSpec((B, 75, 1024), lambda i: (i, 0, 0)),
            pl.BlockSpec((6, 75), lambda i: (0, 0)),
            pl.BlockSpec((6, 1), lambda i: (0, 0)),
            pl.BlockSpec((6, 256, 128), lambda i: (0, 0, 0)),
            pl.BlockSpec((1, 128), lambda i: (0, 0)),
            pl.BlockSpec((128, 128), lambda i: (0, 0)),
            pl.BlockSpec((1, 128), lambda i: (0, 0)),
        ],
        out_specs=pl.BlockSpec((B, 1, 128), lambda i: (i, 0, 0)),
        compiler_params=pltpu.CompilerParams(dimension_semantics=("parallel",)),
    )(patches, wfold, shift, w1r, b1, w2p, b2p)

    return out[:, 0, :10]


# --------------------------- pure-JAX reference ---------------------------

def reference_forward(x, params):
    conv = lax.conv_general_dilated(
        x, params["Wc"], window_strides=(1, 1), padding=((2, 2), (2, 2)),
        dimension_numbers=("NCHW", "OIHW", "NCHW"), precision=lax.Precision.HIGHEST)
    conv = conv + params["bc"][None, :, None, None]
    bn = ((conv - params["mean"][None, :, None, None])
          / jnp.sqrt(params["var"] + EPS)[None, :, None, None]
          * params["gamma"][None, :, None, None]
          + params["beta"][None, :, None, None])
    r = jnp.maximum(bn, 0.0)
    p = lax.reduce_window(r, -jnp.inf, lax.max, (1, 1, 2, 2), (1, 1, 2, 2), "VALID")
    f = p.reshape(x.shape[0], -1)
    h = jnp.dot(f, params["W1"], precision=lax.Precision.HIGHEST) + params["b1"]
    return jnp.dot(h, params["W2"], precision=lax.Precision.HIGHEST) + params["b2"]


# --------------------------------- main -----------------------------------

if __name__ == "__main__":
    key = jax.random.PRNGKey(0)
    ks = jax.random.split(key, 10)
    params = {
        "Wc":    jax.random.normal(ks[0], (6, 3, 5, 5), jnp.float32) * 0.05,   # conv weight (OIHW)
        "bc":    jax.random.normal(ks[1], (6,), jnp.float32) * 0.05,           # conv bias
        "gamma": 1.0 + 0.1 * jax.random.normal(ks[2], (6,), jnp.float32),      # BN weight
        "beta":  0.1 * jax.random.normal(ks[3], (6,), jnp.float32),            # BN bias
        "mean":  0.1 * jax.random.normal(ks[4], (6,), jnp.float32),            # BN running_mean
        "var":   jax.random.uniform(ks[5], (6,), jnp.float32, 0.5, 1.5),       # BN running_var
        "W1":    jax.random.normal(ks[6], (6 * 16 * 16, 128), jnp.float32) * 0.02,
        "b1":    jax.random.normal(ks[7], (1, 128), jnp.float32) * 0.02,
        "W2":    jax.random.normal(ks[8], (128, 10), jnp.float32) * 0.05,
        "b2":    jax.random.normal(ks[9], (1, 10), jnp.float32) * 0.05,
    }
    x = jax.random.normal(jax.random.PRNGKey(1), (2, 3, 32, 32), jnp.float32)

    y = jax.jit(baseline_forward)(x, params)
    y = jax.block_until_ready(y)

    y_ref = reference_forward(x, params)
    err = float(jnp.max(jnp.abs(y - y_ref)))
    assert y.shape == (2, 10), f"bad output shape {y.shape}"
    assert err < 1e-2, f"mismatch vs reference: max abs err {err}"
    print("KERNEL_OK")
</pallas_src>

<mosaic_0001>
module attributes {stable_mosaic.version = 11 : i64} {
  func.func @fused_cnn_kernel(%arg0: i32, %arg1: memref<1x75x1024xbf16, #tpu.memory_space<vmem>>, %arg2: memref<6x75xbf16, #tpu.memory_space<vmem>>, %arg3: memref<6x1xf32, #tpu.memory_space<vmem>>, %arg4: memref<6x256x128xbf16, #tpu.memory_space<vmem>>, %arg5: memref<1x128xf32, #tpu.memory_space<vmem>>, %arg6: memref<128x128xbf16, #tpu.memory_space<vmem>>, %arg7: memref<1x128xf32, #tpu.memory_space<vmem>>, %arg8: memref<1x1x128xf32, #tpu.memory_space<vmem>>) attributes {dimension_semantics = [#tpu.dimension_semantics<parallel>], iteration_bounds = array<i64: 2>, scalar_prefetch = 0 : i64, scratch_operands = 0 : i64, tpu.core_type = #tpu.core_type<tc>, window_params = [{transform_indices = @transform_0, window_bounds = array<i64: 1, 75, 1024>}, {pipeline_mode = #tpu.pipeline_mode<synchronous>, transform_indices = @transform_1, window_bounds = array<i64: 6, 75>}, {pipeline_mode = #tpu.pipeline_mode<synchronous>, transform_indices = @transform_2, window_bounds = array<i64: 6, 1>}, {pipeline_mode = #tpu.pipeline_mode<synchronous>, transform_indices = @transform_3, window_bounds = array<i64: 6, 256, 128>}, {pipeline_mode = #tpu.pipeline_mode<synchronous>, transform_indices = @transform_4, window_bounds = array<i64: 1, 128>}, {pipeline_mode = #tpu.pipeline_mode<synchronous>, transform_indices = @transform_5, window_bounds = array<i64: 128, 128>}, {pipeline_mode = #tpu.pipeline_mode<synchronous>, transform_indices = @transform_6, window_bounds = array<i64: 1, 128>}, {transform_indices = @transform_7, window_bounds = array<i64: 1, 1, 128>}]} {
    %c0 = arith.constant 0 : index
    %c0_0 = arith.constant 0 : index
    %0 = vector.load %arg2[%c0, %c0_0] : memref<6x75xbf16, #tpu.memory_space<vmem>>, vector<6x75xbf16>
    %c0_1 = arith.constant 0 : index
    %c0_2 = arith.constant 0 : index
    %1 = vector.load %arg3[%c0_1, %c0_2] : memref<6x1xf32, #tpu.memory_space<vmem>>, vector<6x1xf32>
    %c0_3 = arith.constant 0 : index
    %c0_4 = arith.constant 0 : index
    %2 = vector.load %arg5[%c0_3, %c0_4] : memref<1x128xf32, #tpu.memory_space<vmem>>, vector<1x128xf32>
    %c0_5 = arith.constant 0 : index
    %c0_6 = arith.constant 0 : index
    %3 = vector.load %arg6[%c0_5, %c0_6] : memref<128x128xbf16, #tpu.memory_space<vmem>>, vector<128x128xbf16>
    %c0_7 = arith.constant 0 : index
    %c0_8 = arith.constant 0 : index
    %4 = vector.load %arg7[%c0_7, %c0_8] : memref<1x128xf32, #tpu.memory_space<vmem>>, vector<1x128xf32>
    %c0_9 = arith.constant 0 : index
    %c0_10 = arith.constant 0 : index
    %c0_11 = arith.constant 0 : index
    %5 = vector.load %arg1[%c0_9, %c0_10, %c0_11] : memref<1x75x1024xbf16, #tpu.memory_space<vmem>>, vector<1x75x1024xbf16>
    %6 = vector.shape_cast %5 : vector<1x75x1024xbf16> to vector<75x1024xbf16>
    %cst = arith.constant dense<0.000000e+00> : vector<6x1024xf32>
    %7 = tpu.matmul %0, %6, %cst {dimension_numbers = #tpu.dot_dimension_numbers<[1], [0], [0], [1], [0, 0, 1, 1], [], []>} : vector<6x75xbf16>, vector<75x1024xbf16>, vector<6x1024xf32> -> vector<6x1024xf32>
    %8 = vector.broadcast %1 : vector<6x1xf32> to vector<6x1024xf32>
    %9 = arith.addf %7, %8 : vector<6x1024xf32>
    %cst_12 = arith.constant 0.000000e+00 : f32
    %10 = vector.broadcast %cst_12 : f32 to vector<6x1024xf32>
    %11 = arith.maximumf %9, %10 : vector<6x1024xf32>
    %12 = vector.extract_strided_slice %11 {offsets = [0, 0], sizes = [6, 256], strides = [1, 1]} : vector<6x1024xf32> to vector<6x256xf32>
    %13 = vector.extract_strided_slice %11 {offsets = [0, 256], sizes = [6, 256], strides = [1, 1]} : vector<6x1024xf32> to vector<6x256xf32>
    %14 = arith.maximumf %12, %13 : vector<6x256xf32>
    %15 = vector.extract_strided_slice %11 {offsets = [0, 512], sizes = [6, 256], strides = [1, 1]} : vector<6x1024xf32> to vector<6x256xf32>
    %16 = vector.extract_strided_slice %11 {offsets = [0, 768], sizes = [6, 256], strides = [1, 1]} : vector<6x1024xf32> to vector<6x256xf32>
    %17 = arith.maximumf %15, %16 : vector<6x256xf32>
    %18 = arith.maximumf %14, %17 : vector<6x256xf32>
    %19 = arith.truncf %18 : vector<6x256xf32> to vector<6x256xbf16>
    %20 = vector.extract_strided_slice %19 {offsets = [0, 0], sizes = [1, 256], strides = [1, 1]} : vector<6x256xbf16> to vector<1x256xbf16>
    %c0_13 = arith.constant 0 : index
    %c0_14 = arith.constant 0 : index
    %c0_15 = arith.constant 0 : index
    %21 = vector.load %arg4[%c0_13, %c0_14, %c0_15] : memref<6x256x128xbf16, #tpu.memory_space<vmem>>, vector<1x256x128xbf16>
    %22 = vector.shape_cast %21 : vector<1x256x128xbf16> to vector<256x128xbf16>
    %cst_16 = arith.constant dense<0.000000e+00> : vector<1x128xf32>
    %23 = tpu.matmul %20, %22, %cst_16 {dimension_numbers = #tpu.dot_dimension_numbers<[1], [0], [0], [1], [0, 0, 1, 1], [], []>} : vector<1x256xbf16>, vector<256x128xbf16>, vector<1x128xf32> -> vector<1x128xf32>
    %24 = arith.addf %2, %23 : vector<1x128xf32>
    %25 = vector.extract_strided_slice %19 {offsets = [1, 0], sizes = [1, 256], strides = [1, 1]} : vector<6x256xbf16> to vector<1x256xbf16>
    %c1 = arith.constant 1 : index
    %c0_17 = arith.constant 0 : index
    %c0_18 = arith.constant 0 : index
    %26 = vector.load %arg4[%c1, %c0_17, %c0_18] : memref<6x256x128xbf16, #tpu.memory_space<vmem>>, vector<1x256x128xbf16>
    %27 = vector.shape_cast %26 : vector<1x256x128xbf16> to vector<256x128xbf16>
    %cst_19 = arith.constant dense<0.000000e+00> : vector<1x128xf32>
    %28 = tpu.matmul %25, %27, %cst_19 {dimension_numbers = #tpu.dot_dimension_numbers<[1], [0], [0], [1], [0, 0, 1, 1], [], []>} : vector<1x256xbf16>, vector<256x128xbf16>, vector<1x128xf32> -> vector<1x128xf32>
    %29 = arith.addf %24, %28 : vector<1x128xf32>
    %30 = vector.extract_strided_slice %19 {offsets = [2, 0], sizes = [1, 256], strides = [1, 1]} : vector<6x256xbf16> to vector<1x256xbf16>
    %c2 = arith.constant 2 : index
    %c0_20 = arith.constant 0 : index
    %c0_21 = arith.constant 0 : index
    %31 = vector.load %arg4[%c2, %c0_20, %c0_21] : memref<6x256x128xbf16, #tpu.memory_space<vmem>>, vector<1x256x128xbf16>
    %32 = vector.shape_cast %31 : vector<1x256x128xbf16> to vector<256x128xbf16>
    %cst_22 = arith.constant dense<0.000000e+00> : vector<1x128xf32>
    %33 = tpu.matmul %30, %32, %cst_22 {dimension_numbers = #tpu.dot_dimension_numbers<[1], [0], [0], [1], [0, 0, 1, 1], [], []>} : vector<1x256xbf16>, vector<256x128xbf16>, vector<1x128xf32> -> vector<1x128xf32>
    %34 = arith.addf %29, %33 : vector<1x128xf32>
    %35 = vector.extract_strided_slice %19 {offsets = [3, 0], sizes = [1, 256], strides = [1, 1]} : vector<6x256xbf16> to vector<1x256xbf16>
    %c3 = arith.constant 3 : index
    %c0_23 = arith.constant 0 : index
    %c0_24 = arith.constant 0 : index
    %36 = vector.load %arg4[%c3, %c0_23, %c0_24] : memref<6x256x128xbf16, #tpu.memory_space<vmem>>, vector<1x256x128xbf16>
    %37 = vector.shape_cast %36 : vector<1x256x128xbf16> to vector<256x128xbf16>
    %cst_25 = arith.constant dense<0.000000e+00> : vector<1x128xf32>
    %38 = tpu.matmul %35, %37, %cst_25 {dimension_numbers = #tpu.dot_dimension_numbers<[1], [0], [0], [1], [0, 0, 1, 1], [], []>} : vector<1x256xbf16>, vector<256x128xbf16>, vector<1x128xf32> -> vector<1x128xf32>
    %39 = arith.addf %34, %38 : vector<1x128xf32>
    %40 = vector.extract_strided_slice %19 {offsets = [4, 0], sizes = [1, 256], strides = [1, 1]} : vector<6x256xbf16> to vector<1x256xbf16>
    %c4 = arith.constant 4 : index
    %c0_26 = arith.constant 0 : index
    %c0_27 = arith.constant 0 : index
    %41 = vector.load %arg4[%c4, %c0_26, %c0_27] : memref<6x256x128xbf16, #tpu.memory_space<vmem>>, vector<1x256x128xbf16>
    %42 = vector.shape_cast %41 : vector<1x256x128xbf16> to vector<256x128xbf16>
    %cst_28 = arith.constant dense<0.000000e+00> : vector<1x128xf32>
    %43 = tpu.matmul %40, %42, %cst_28 {dimension_numbers = #tpu.dot_dimension_numbers<[1], [0], [0], [1], [0, 0, 1, 1], [], []>} : vector<1x256xbf16>, vector<256x128xbf16>, vector<1x128xf32> -> vector<1x128xf32>
    %44 = arith.addf %39, %43 : vector<1x128xf32>
    %45 = vector.extract_strided_slice %19 {offsets = [5, 0], sizes = [1, 256], strides = [1, 1]} : vector<6x256xbf16> to vector<1x256xbf16>
    %c5 = arith.constant 5 : index
    %c0_29 = arith.constant 0 : index
    %c0_30 = arith.constant 0 : index
    %46 = vector.load %arg4[%c5, %c0_29, %c0_30] : memref<6x256x128xbf16, #tpu.memory_space<vmem>>, vector<1x256x128xbf16>
    %47 = vector.shape_cast %46 : vector<1x256x128xbf16> to vector<256x128xbf16>
    %cst_31 = arith.constant dense<0.000000e+00> : vector<1x128xf32>
    %48 = tpu.matmul %45, %47, %cst_31 {dimension_numbers = #tpu.dot_dimension_numbers<[1], [0], [0], [1], [0, 0, 1, 1], [], []>} : vector<1x256xbf16>, vector<256x128xbf16>, vector<1x128xf32> -> vector<1x128xf32>
    %49 = arith.addf %44, %48 : vector<1x128xf32>
    %50 = arith.truncf %49 : vector<1x128xf32> to vector<1x128xbf16>
    %cst_32 = arith.constant dense<0.000000e+00> : vector<1x128xf32>
    %51 = tpu.matmul %50, %3, %cst_32 {dimension_numbers = #tpu.dot_dimension_numbers<[1], [0], [0], [1], [0, 0, 1, 1], [], []>} : vector<1x128xbf16>, vector<128x128xbf16>, vector<1x128xf32> -> vector<1x128xf32>
    %52 = arith.addf %51, %4 : vector<1x128xf32>
    %c0_33 = arith.constant 0 : index
    %c0_34 = arith.constant 0 : index
    %c0_35 = arith.constant 0 : index
    %53 = vector.load %arg8[%c0_33, %c0_34, %c0_35] : memref<1x1x128xf32, #tpu.memory_space<vmem>>, vector<1x1x128xf32>
    %54 = vector.shape_cast %53 : vector<1x1x128xf32> to vector<1x128xf32>
    %55 = vector.shape_cast %52 : vector<1x128xf32> to vector<1x1x128xf32>
    tpu.vector_store %arg8[%c0_33, %c0_34, %c0_35], %55 {strides = array<i32>} : memref<1x1x128xf32, #tpu.memory_space<vmem>>, vector<1x1x128xf32>,
    return
  }
  func.func @transform_0(%arg0: i32) -> (i32, i32, i32) {
    %c0_i32 = arith.constant 0 : i32
    %c0_i32_0 = arith.constant 0 : i32
    %c0_i32_1 = arith.constant 0 : i32
    return %arg0, %c0_i32, %c0_i32_0 : i32, i32, i32
  }
  func.func @transform_1(%arg0: i32) -> (i32, i32) {
    %c0_i32 = arith.constant 0 : i32
    %c0_i32_0 = arith.constant 0 : i32
    %c0_i32_1 = arith.constant 0 : i32
    return %c0_i32, %c0_i32_0 : i32, i32
  }
  func.func @transform_2(%arg0: i32) -> (i32, i32) {
    %c0_i32 = arith.constant 0 : i32
    %c0_i32_0 = arith.constant 0 : i32
    %c0_i32_1 = arith.constant 0 : i32
    return %c0_i32, %c0_i32_0 : i32, i32
  }
  func.func @transform_3(%arg0: i32) -> (i32, i32, i32) {
    %c0_i32 = arith.constant 0 : i32
    %c0_i32_0 = arith.constant 0 : i32
    %c0_i32_1 = arith.constant 0 : i32
    %c0_i32_2 = arith.constant 0 : i32
    return %c0_i32, %c0_i32_0, %c0_i32_1 : i32, i32, i32
  }
  func.func @transform_4(%arg0: i32) -> (i32, i32) {
    %c0_i32 = arith.constant 0 : i32
    %c0_i32_0 = arith.constant 0 : i32
    %c0_i32_1 = arith.constant 0 : i32
    return %c0_i32, %c0_i32_0 : i32, i32
  }
  func.func @transform_5(%arg0: i32) -> (i32, i32) {
    %c0_i32 = arith.constant 0 : i32
    %c0_i32_0 = arith.constant 0 : i32
    %c0_i32_1 = arith.constant 0 : i32
    return %c0_i32, %c0_i32_0 : i32, i32
  }
  func.func @transform_6(%arg0: i32) -> (i32, i32) {
    %c0_i32 = arith.constant 0 : i32
    %c0_i32_0 = arith.constant 0 : i32
    %c0_i32_1 = arith.constant 0 : i32
    return %c0_i32, %c0_i32_0 : i32, i32
  }
  func.func @transform_7(%arg0: i32) -> (i32, i32, i32) {
    %c0_i32 = arith.constant 0 : i32
    %c0_i32_0 = arith.constant 0 : i32
    %c0_i32_1 = arith.constant 0 : i32
    return %arg0, %c0_i32, %c0_i32_0 : i32, i32, i32
  }
}

</mosaic_0001>

<bundles_post_ra>
// kernel: baseline_forward.1
= control target key start
LH: loop header
LB: loop body
LE: loop exit
PB: predicated region body
PF: predicated region fallthrough
CT: control target
= control target key end

     0   :  { %12 = vsyncpa [#allocation3], 0  ;;  %s3194_s0 = inlined_call_operand.vmem [shape: bf16[2,75,1024], index: 0, kind: input, shape index: {}]   ;;  %s3195_s1 = inlined_call_operand.vmem [shape: bf16[6,75], index: 1, kind: input, shape index: {}]   ;;  %s3196_s2 = inlined_call_operand.vmem [shape: f32[6,1], index: 2, kind: input, shape index: {}]   ;;  %s3197_s3 = inlined_call_operand.vmem [shape: bf16[6,256,128], index: 3, kind: input, shape index: {}]   ;;  %s3198_s4 = inlined_call_operand.vmem [shape: f32[1,128], index: 4, kind: input, shape index: {}]   ;;  %s3199_s5 = inlined_call_operand.vmem [shape: bf16[128,128], index: 5, kind: input, shape index: {}]   ;;  %s3200_s6 = inlined_call_operand.vmem [shape: f32[1,128], index: 6, kind: input, shape index: {}]   ;;  %s3201_s7 = inlined_call_operand.hbm [shape: f32[2,1,128], index: 7, kind: output, shape index: {}]  }
   0x1   :  { %14 = vsyncpa [#allocation3 + $0x1], 0  ;;  %s2682_s24 = smov 0   ;;  %s2684_s25 = smov 0  }
   0x2   :  { %s2686_s26 = smov 0   ;;  %s2688_s27 = smov 0  }
   0x3 LB: > { %s2703_s28 = sadd.s32 4294967295, %s2635_s27   ;;  %s1949_s29 = sadd.s32 4294967294, %s2635_s27   ;;  %s2635_s27 = sphi %s2688_s27, %s3207_s27   ;;  %s2631_s26 = sphi %s2686_s26, %s3206_s26   ;;  %s2627_s25 = sphi %s2684_s25, %s3205_s25   ;;  %s2623_s24 = sphi %s2682_s24, %s3204_s24  }
   0x4   : > { %s2707_s30 = sadd.s32 1, %s2635_s27   ;;  %s179_s8 = sadd.s32 1, %s2631_s26 }
   0x5   : > { %s176_s9 = ssub.s32 %s2635_s27, %s2707_s30  ;;  %p189_p0 = scmp.ne.s32.totalorder %s2631_s26, %s2627_s25 }
   0x6   : > { %p177_p1 = scmp.eq.s32.totalorder %s176_s9, 0  ;;  %p190_p2 = scmp.eq.s32.totalorder %s2703_s28, 1 }
   0x7   : > { %p195_p3 = scmp.ne.s32.totalorder %s2627_s25, %s2623_s24  ;;  %p196_p4 = scmp.eq.s32.totalorder %s1949_s29, 1 }
   0x8   : > { %s2718_s10 = scalar_select %p177_p1, %s2631_s26, %s179_s8  }
   0x9   : > { %p2720_p5 = por %p190_p2, %p189_p0  ;;  %p2724_p6 = por %p196_p4, %p195_p3 }
   0xa   : > { %p1952_p7 = scmp.ge.s32.totalorder %s2635_s27, 1  ;;  %p240_p8 = scmp.lt.s32.totalorder %s2635_s27, 3 }
   0xc   : > { %p241_p9 = pnand %p1952_p7, %p240_p8 }
   0xd   : > { %p271_p10 = scmp.lt.s32.totalorder (!%p241_p9), %s2703_s28, 1  ;;  %s269_s22 = sand.u32 (!%p241_p9), 1, %s2627_s25  }
   0xe   : > { %244 = sbr.rel (%p241_p9) target bundleno = 772 (0x304), region = 48  ;;  %s2262_s8 = sshll.u32 (!%p241_p9), %s2703_s28, 4 }
   0xf   : > { %s270_s9 = scalar_lea.vmem (!%p241_p9), [#allocation2], %s269_s22  ;;  %s1882_s17 = scalar_lea.sflag (!%p241_p9), [#allocation3], %s269_s22 }
  0x10   : > { %s1894_s13 = sshll.u32 (!%p241_p9), %s270_s9, 4  ;;  %s3155_s13 = int_to_ptr.vmem [resolvable:$true] %s1894_s13 }
  0x11   : > { %s2575_s18 = scalar_lea.vmem (!%p241_p9), %s3155_s13, 16 }
  0x12   : > { %p2576_p11 = scmp.ne.s32.totalorder (!%p241_p9), %s3155_s13, %s2575_s18 }
  0x13   : > { %vm538_vm0 = vcmask 1044480   ;;  %v2637_v0 = vmov 0   ;;  %v278_v1 = vld [vmem:[%s3196_s2] sm:$0x3f]  ;;  %s272_s15 = scalar_select %p271_p10, %s2703_s28, 1  ;;  %vm539_vm1 = vcmask 1045504  }
  0x14   : > { %598 = vmatprep.mubr.bf16.mxu1 %v2637_v0  ;;  %680 = vmatprep.mubr.bf16.mxu0 %v2637_v0  ;;  %v2638_v2 = vmov 65535   ;;  %vm534_vm2 = vcmask 613376   ;;  %v2777_v53 = vld [vmem:[%s3195_s1] sm:$0x7]  ;;  %vm2640_vm3 = vmmov 0   ;;  %p2577_p12 = pnand %p2576_p11, %p2720_p5  ;;  %s2641_s28 = smov [#allocation2]  }
  0x15   : > { %2470 = vset.pattern.permute.xlu0 %v2637_v0  ;;  %s2426_s16 = smul.u32 320, %s272_s15  ;;  %v540_v3 = vsel %vm538_vm0, 4294967295, %v2638_v2 }
  0x16   : > { %339 = vperm.xlu0 %2470, %v278_v1   ;;  %v2745_v6 = vsel %vm539_vm1, %v540_v3, 0  ;;  %p2578_p13 = pneg %p2577_p12 }
  0x17   : > { %s2741_s19 = scalar_lea.vmem %s3194_s0, %s2426_s16  ;;  %s3153_s16 = scalar_lea.hbm %s3201_s7, %s2262_s8 }
  0x18   : > { %v329_v4 = vld [vmem:[%s2741_s19 + $0x100] sm:$0xff]  ;;  %v331_v17 = vld [vmem:[%s2741_s19 + $0x110] sm:$0xff]  ;;  %v330_v35 = vld [vmem:[%s2741_s19 + $0x108] sm:$0xff] }
  0x19   : > { %v333_v5 = vld [vmem:[%s2741_s19 + $0x120] sm:$0x33]  ;;  %v335_v18 = vld [vmem:[%s2741_s19 + $0x130] sm:$0x33]  ;;  %v334_v36 = vld [vmem:[%s2741_s19 + $0x128] sm:$0x33] }
  0x1a   : > { %v321_v7 = vld [vmem:[%s2741_s19 + $0xc0] sm:$0xff]  ;;  %v1987_v8 = vcombine.high %v329_v4, %v333_v5  ;;  %v1986_v9 = vcombine.low %v329_v4, %v333_v5  ;;  %v1991_v20 = vcombine.high %v331_v17, %v335_v18  ;;  %v1990_v21 = vcombine.low %v331_v17, %v335_v18  ;;  %v323_v22 = vld [vmem:[%s2741_s19 + $0xd0] sm:$0xff]  ;;  %v322_v50 = vld [vmem:[%s2741_s19 + $0xc8] sm:$0xff] }
  0x1b   : > { %v325_v10 = vld [vmem:[%s2741_s19 + $0xe0] sm:$0xff]  ;;  %v327_v23 = vld [vmem:[%s2741_s19 + $0xf0] sm:$0xff]  ;;  %v1989_v43 = vcombine.high %v330_v35, %v334_v36  ;;  %v1988_v49 = vcombine.low %v330_v35, %v334_v36  ;;  %v326_v51 = vld [vmem:[%s2741_s19 + $0xe8] sm:$0xff] }
  0x1c   : > { %v546_v11 = vand.u32 %v1987_v8, %v2745_v6  ;;  %v543_v12 = vand.u32 %v1986_v9, %v2745_v6  ;;  %v1979_v13 = vcombine.high %v321_v7, %v325_v10  ;;  %v313_v14 = vld [vmem:[%s2741_s19 + $0x80] sm:$0xff]  ;;  %v1978_v16 = vcombine.low %v321_v7, %v325_v10  ;;  %v315_v30 = vld [vmem:[%s2741_s19 + $0x90] sm:$0xff]  ;;  %v314_v57 = vld [vmem:[%s2741_s19 + $0x88] sm:$0xff] }
  0x1d   : > { %v317_v15 = vld [vmem:[%s2741_s19 + $0xa0] sm:$0xff]  ;;  %v558_v26 = vand.u32 %v1991_v20, %v2745_v6  ;;  %v555_v27 = vand.u32 %v1990_v21, %v2745_v6  ;;  %v1983_v28 = vcombine.high %v323_v22, %v327_v23  ;;  %v319_v31 = vld [vmem:[%s2741_s19 + $0xb0] sm:$0xff]  ;;  %v1982_v37 = vcombine.low %v323_v22, %v327_v23  ;;  %v318_v58 = vld [vmem:[%s2741_s19 + $0xa8] sm:$0xff] }
  0x1e   : > { %572 = vmatprep.subr.bf16.mxu1 %v546_v11  ;;  %v1971_v19 = vcombine.high %v313_v14, %v317_v15  ;;  %v305_v24 = vld [vmem:[%s2741_s19 + $0x40] sm:$0xff]  ;;  %v1970_v29 = vcombine.low %v313_v14, %v317_v15  ;;  %v307_v38 = vld [vmem:[%s2741_s19 + $0x50] sm:$0xff]  ;;  %v1975_v39 = vcombine.high %v315_v30, %v319_v31  ;;  %v1974_v44 = vcombine.low %v315_v30, %v319_v31  ;;  %v306_v62 = vld [vmem:[%s2741_s19 + $0x48] sm:$0xff] }
  0x1f   : > { %573 = vmatpush1.bf16.msra.mxu1 %v543_v12  ;;  %v309_v25 = vld [vmem:[%s2741_s19 + $0x60] sm:$0xff]  ;;  %654 = vmatprep.subr.bf16.mxu0 %v558_v26  ;;  %v311_v40 = vld [vmem:[%s2741_s19 + $0x70] sm:$0xff]  ;;  %v552_v52 = vand.u32 %v1989_v43, %v2745_v6  ;;  %v549_v56 = vand.u32 %v1988_v49, %v2745_v6  ;;  %v1981_v59 = vcombine.high %v322_v50, %v326_v51  ;;  %v310_v63 = vld [vmem:[%s2741_s19 + $0x68] sm:$0xff] }
  0x20   : > { %574 = vmatprep.subr.bf16.mxu1 %v1979_v13  ;;  %v1963_v32 = vcombine.high %v305_v24, %v309_v25  ;;  %v297_v33 = vld [vmem:[%s2741_s19] sm:$0xff]  ;;  %655 = vmatpush1.bf16.msra.mxu0 %v555_v27  ;;  %v1962_v41 = vcombine.low %v305_v24, %v309_v25  ;;  %v299_v45 = vld [vmem:[%s2741_s19 + $0x10] sm:$0xff]  ;;  %v1967_v47 = vcombine.high %v307_v38, %v311_v40  ;;  %v298_v3 = vld [vmem:[%s2741_s19 + $0x8] sm:$0xff] }
  0x21   : > { %v301_v34 = vld [vmem:[%s2741_s19 + $0x20] sm:$0xff]  ;;  %656 = vmatprep.subr.bf16.mxu0 %v1983_v28  ;;  %v303_v46 = vld [vmem:[%s2741_s19 + $0x30] sm:$0xff]  ;;  %v1966_v54 = vcombine.low %v307_v38, %v311_v40  ;;  %v1980_v61 = vcombine.low %v322_v50, %v326_v51  ;;  %v1973_v1 = vcombine.high %v314_v57, %v318_v58  ;;  %v1972_v2 = vcombine.low %v314_v57, %v318_v58  ;;  %v302_v4 = vld [vmem:[%s2741_s19 + $0x28] sm:$0xff] }
  0x22   : > { %v1955_v42 = vcombine.high %v297_v33, %v301_v34  ;;  %v1954_v48 = vcombine.low %v297_v33, %v301_v34  ;;  %v1959_v55 = vcombine.high %v299_v45, %v303_v46  ;;  %v1958_v60 = vcombine.low %v299_v45, %v303_v46  ;;  %v332_v5 = vld [vmem:[%s2741_s19 + $0x118] sm:$0xff]  ;;  %v2475_v34 = vld [vmem:[%s3197_s3 + $0x70] sm:$0xff]   ;;  %v2479_v38 = vld [vmem:[%s3197_s3 + $0x68] sm:$0xff]  }
  0x23   : > { %575 = vmatpush1.bf16.msra.mxu1 %v1978_v16  ;;  %v336_v7 = vld [vmem:[%s2741_s19 + $0x138] sm:$0x33]  ;;  %v1965_v8 = vcombine.high %v306_v62, %v310_v63  ;;  %v1964_v9 = vcombine.low %v306_v62, %v310_v63  ;;  %v1957_v10 = vcombine.high %v298_v3, %v302_v4  ;;  %v1956_v12 = vcombine.low %v298_v3, %v302_v4  ;;  %v2476_v35 = vld [vmem:[%s3197_s3 + $0x30] sm:$0xff]   ;;  %v2481_v40 = vld [vmem:[%s3197_s3 + $0xe8] sm:$0xff]  }
  0x24   : > { %576 = vmatprep.subr.bf16.mxu1 %v1971_v19  ;;  %657 = vmatpush1.bf16.msra.mxu0 %v1982_v37  ;;  %v1993_v11 = vcombine.high %v332_v5, %v336_v7  ;;  %v1992_v13 = vcombine.low %v332_v5, %v336_v7  ;;  %v324_v14 = vld [vmem:[%s2741_s19 + $0xd8] sm:$0xff]  ;;  %v2477_v36 = vld [vmem:[%s3197_s3 + $0xf0] sm:$0xff]   ;;  %v2485_v43 = vld [vmem:[%s3197_s3 + $0xe0] sm:$0xff]  }
  0x25   : > { %658 = vmatprep.subr.bf16.mxu0 %v1975_v39  ;;  %v328_v15 = vld [vmem:[%s2741_s19 + $0xf8] sm:$0xff]  ;;  %v2478_v37 = vld [vmem:[%s3197_s3 + $0xb0] sm:$0xff]   ;;  %v2480_v39 = vld [vmem:[%s3197_s3 + $0x28] sm:$0xff]  }
  0x26   : > { %v564_v16 = vand.u32 %v1993_v11, %v2745_v6  ;;  %v561_v17 = vand.u32 %v1992_v13, %v2745_v6  ;;  %v316_v18 = vld [vmem:[%s2741_s19 + $0x98] sm:$0xff]  ;;  %v1985_v20 = vcombine.high %v324_v14, %v328_v15  ;;  %v1984_v21 = vcombine.low %v324_v14, %v328_v15  ;;  %v2486_v46 = vld [vmem:[%s3197_s3 + $0xa0] sm:$0xff]   ;;  %v2491_v50 = vld [vmem:[%s3197_s3 + $0x50] sm:$0xff]  }
  0x27   : > { %577 = vmatpush1.bf16.msra.mxu1 %v1970_v29  ;;  %v320_v19 = vld [vmem:[%s2741_s19 + $0xb8] sm:$0xff]  ;;  %v2492_v51 = vld [vmem:[%s3197_s3 + $0x10] sm:$0xff]   ;;  %v2498_v57 = vld [vmem:[%s3197_s3 + $0x88] sm:$0xff]  }
  0x28   : > { %578 = vmatprep.subr.bf16.mxu1 %v1963_v32  ;;  %659 = vmatpush1.bf16.msra.mxu0 %v1974_v44  ;;  %v308_v22 = vld [vmem:[%s2741_s19 + $0x58] sm:$0xff]  ;;  %v1977_v24 = vcombine.high %v316_v18, %v320_v19  ;;  %v1976_v25 = vcombine.low %v316_v18, %v320_v19  ;;  %v2484_v44 = vld [vmem:[%s3197_s3 + $0x20] sm:$0xff]  }
  0x29   : > { %660 = vmatprep.subr.bf16.mxu0 %v1967_v47  ;;  %v312_v23 = vld [vmem:[%s2741_s19 + $0x78] sm:$0xff]  ;;  %v2499_v58 = vld [vmem:[%s3197_s3 + $0x40] sm:$0xff]  }
  0x2a   : > { %v300_v26 = vld [vmem:[%s2741_s19 + $0x18] sm:$0xff]  ;;  %v1969_v27 = vcombine.high %v308_v22, %v312_v23  ;;  %v1968_v28 = vcombine.low %v308_v22, %v312_v23 }
  0x2b   : > { %579 = vmatpush1.bf16.msra.mxu1 %v1962_v41  ;;  %v304_v6 = vld [vmem:[%s2741_s19 + $0x38] sm:$0xff]  ;;  %v2482_v41 = vld [vmem:[%s3197_s3 + $0xa8] sm:$0xff]   ;;  %s2579_s19 = sshll.u32 %s2641_s28, 4  ;;  %s2580_s19 = int_to_ptr.vmem [resolvable:$false] %s2579_s19 }
  0x2c   : > { %580 = vmatprep.subr.bf16.mxu1 %v1955_v42  ;;  %661 = vmatpush1.bf16.msra.mxu0 %v1966_v54  ;;  %v1961_v29 = vcombine.high %v300_v26, %v304_v6  ;;  %v1960_v30 = vcombine.low %v300_v26, %v304_v6  ;;  %v2472_v31 = vld [vmem:[%s3197_s3 + $0x38] sm:$0xff]   ;;  %v2483_v42 = vld [vmem:[%s3197_s3 + $0x60] sm:$0xff]   ;;  %v2495_v54 = vld [vmem:[%s3197_s3 + $0x48] sm:$0xff]   ;;  %s2581_s20 = scalar_lea.vmem %s2580_s19, 32  ;;  %p2582_p0 = scmp.lt.s32.totalorder %s3155_s13, %s2580_s19 }
  0x2d   : > { %662 = vmatprep.subr.bf16.mxu0 %v1959_v55  ;;  %v2473_v32 = vld [vmem:[%s3197_s3 + $0xf8] sm:$0xff]   ;;  %v2496_v55 = vld [vmem:[%s3197_s3 + $0x8] sm:$0xff]   ;;  %p2583_p1 = scmp.lt.s32.totalorder %s2581_s20, %s2575_s18 }
  0x2e   : > { %v2474_v33 = vld [vmem:[%s3197_s3 + $0xb8] sm:$0xff]  }
  0x2f   : > { %581 = vmatpush1.bf16.msra.mxu1 %v1954_v48  ;;  %v2487_v45 = vld [vmem:[%s3197_s3 + $0x58] sm:$0xff]   ;;  %p2584_p2 = por %p2583_p1, %p2582_p0 }
  0x30   : > { %613 = vmatprep.subr.bf16.mxu1 %v552_v52  ;;  %663 = vmatpush1.bf16.msra.mxu0 %v1958_v60  ;;  %v2489_v47 = vld [vmem:[%s3197_s3 + $0xd8] sm:$0xff]   ;;  %v2493_v52 = vld [vmem:[%s3197_s3 + $0xd0] sm:$0xff]   ;;  %v2501_v60 = vld [vmem:[%s3197_s3 + $0xc0] sm:$0xff]  }
  0x31   : > { %v2488_v48 = vld [vmem:[%s3197_s3 + $0x18] sm:$0xff]   ;;  %p2585_p3 = pnand %p2584_p2, %p2578_p13 }
  0x32   : > { %1994 = vmatmul.mubr.msk.bf16.vlgmr.msra.gmra.mxu1 %vm534_vm2, %v2777_v53  ;;  %v2490_v49 = vld [vmem:[%s3197_s3 + $0x98] sm:$0xff]  }
  0x33   : > { %614 = vmatpush1.bf16.msra.mxu1 %v549_v56  ;;  %639 = vmatprep.mubr.bf16.mxu1 %v2637_v0  ;;  %v2497_v56 = vld [vmem:[%s3197_s3 + $0xc8] sm:$0xff]   ;;  %v2503_v62 = vld [vmem:[%s3197_s3 + $0x178] sm:$0xff]  }
  0x34   : > { %615 = vmatprep.subr.bf16.mxu1 %v1981_v59  ;;  %1996 = vmatmul.mubr.msk.bf16.vlgmr.msra.gmra.mxu0 %vm534_vm2, %v2777_v53  ;;  %v2500_v59 = vld [vmem:[%s3197_s3] sm:$0xff]   ;;  %v2505_v63 = vld [vmem:[%s3197_s3 + $0x1f8] sm:$0xff]  }
  0x37   : > { %616 = vmatpush1.bf16.msra.mxu1 %v1980_v61  ;;  %v2502_v61 = vld [vmem:[%s3197_s3 + $0x80] sm:$0xff]  }
  0x38   : > { %617 = vmatprep.subr.bf16.mxu1 %v1973_v1 }
  0x3b   : > { %618 = vmatpush1.bf16.msra.mxu1 %v1972_v2 }
  0x3c   : > { %619 = vmatprep.subr.bf16.mxu1 %v1965_v8 }
  0x3f   : > { %620 = vmatpush1.bf16.msra.mxu1 %v1964_v9 }
  0x40   : > { %621 = vmatprep.subr.bf16.mxu1 %v1957_v10 }
  0x43   : > { %622 = vmatpush1.bf16.msra.mxu1 %v1956_v12 }
  0x44   : > { %695 = vmatprep.subr.bf16.mxu1 %v564_v16 }
  0x46   : > { %1995 = vmatmul.mubr.msk.bf16.vlgmr.msra.gmra.mxu1 %vm534_vm2, %v2777_v53 }
  0x47   : > { %696 = vmatpush1.bf16.msra.mxu1 %v561_v17  ;;  %721 = vmatprep.mubr.bf16.mxu1 %v2637_v0  ;;  %v2471_v0 = vld [vmem:[%s3197_s3 + $0x78] sm:$0xff]  }
  0x48   : > { %697 = vmatprep.subr.bf16.mxu1 %v1985_v20  ;;  %2265 = vmatprep.subr.bf16.mxu0 %v2471_v0 }
  0x49   : > { %2266 = vmatpush3.bf16.msra.mxu0 %v2472_v31 }
  0x4a   : > { %2267 = vmatprep.subr.bf16.mxu0 %v2475_v34 }
  0x4b   : > { %698 = vmatpush1.bf16.msra.mxu1 %v1984_v21 }
  0x4c   : > { %699 = vmatprep.subr.bf16.mxu1 %v1977_v24 }
  0x4d   : > { %2268 = vmatpush3.bf16.msra.mxu0 %v2476_v35 }
  0x4e   : > { %2269 = vmatprep.subr.bf16.mxu0 %v2479_v38 }
  0x4f   : > { %700 = vmatpush1.bf16.msra.mxu1 %v1976_v25 }
  0x50   : > { %701 = vmatprep.subr.bf16.mxu1 %v1969_v27 }
  0x51   : > { %2270 = vmatpush3.bf16.msra.mxu0 %v2480_v39 }
  0x52   : > { %2271 = vmatprep.subr.bf16.mxu0 %v2483_v42 }
  0x53   : > { %702 = vmatpush1.bf16.msra.mxu1 %v1968_v28 }
  0x54   : > { %703 = vmatprep.subr.bf16.mxu1 %v1961_v29 }
  0x55   : > { %2272 = vmatpush3.bf16.msra.mxu0 %v2484_v44  ;;  %v2506_v44 = vld [vmem:[%s3197_s3 + $0x1b8] sm:$0xff]  }
  0x56   : > { %2273 = vmatprep.subr.bf16.mxu0 %v2487_v45  ;;  %v2507_v45 = vld [vmem:[%s3197_s3 + $0x170] sm:$0xff]  }
  0x57   : > { %704 = vmatpush1.bf16.msra.mxu1 %v1960_v30 }
  0x58   : > { %2287 = vmatprep.subr.bf16.mxu1 %v2473_v32 }
  0x59   : > { %2274 = vmatpush3.bf16.msra.mxu0 %v2488_v48 }
  0x5a   : > { %1997 = vmatmul.mubr.msk.bf16.vlgmr.msra.gmra.mxu1 %vm534_vm2, %v2777_v53  ;;  %2275 = vmatprep.subr.bf16.mxu0 %v2491_v50  ;;  %v2494_v53 = vld [vmem:[%s3197_s3 + $0x90] sm:$0xff]   ;;  %v2511_v50 = vld [vmem:[%s3197_s3 + $0x168] sm:$0xff]  }
  0x5b   : > { %2288 = vmatpush3.bf16.msra.mxu1 %v2474_v33 }
  0x5c   : > { %2289 = vmatprep.subr.bf16.mxu1 %v2477_v36 }
  0x5d   : > { %2276 = vmatpush3.bf16.msra.mxu0 %v2492_v51  ;;  %v2510_v51 = vld [vmem:[%s3197_s3 + $0x1b0] sm:$0xff]  }
  0x5e   : > { %2277 = vmatprep.subr.bf16.mxu0 %v2495_v54  ;;  %v2515_v54 = vld [vmem:[%s3197_s3 + $0x160] sm:$0xff]  }
  0x5f   : > { %2290 = vmatpush3.bf16.msra.mxu1 %v2478_v37 }
  0x60   : > { %2291 = vmatprep.subr.bf16.mxu1 %v2481_v40 }
  0x61   : > { %2278 = vmatpush3.bf16.msra.mxu0 %v2496_v55  ;;  %v2514_v55 = vld [vmem:[%s3197_s3 + $0x1a8] sm:$0xff]  }
  0x62   : > { %2279 = vmatprep.subr.bf16.mxu0 %v2499_v58  ;;  %v2519_v58 = vld [vmem:[%s3197_s3 + $0x158] sm:$0xff]  }
  0x63   : > { %2292 = vmatpush3.bf16.msra.mxu1 %v2482_v41  ;;  %v2504_v41 = vld [vmem:[%s3197_s3 + $0x138] sm:$0xff]  }
  0x64   : > { %2293 = vmatprep.subr.bf16.mxu1 %v2485_v43 }
  0x65   : > { %2280 = vmatpush3.bf16.msra.mxu0 %v2500_v59  ;;  %v2518_v59 = vld [vmem:[%s3197_s3 + $0x1a0] sm:$0xff]  }
  0x66   : > { %2309 = vmatprep.subr.bf16.mxu0 %v2503_v62  ;;  %v2523_v62 = vld [vmem:[%s3197_s3 + $0x150] sm:$0xff]  }
  0x67   : > { %2294 = vmatpush3.bf16.msra.mxu1 %v2486_v46 }
  0x68   : > { %2295 = vmatprep.subr.bf16.mxu1 %v2489_v47  ;;  %v2509_v47 = vld [vmem:[%s3197_s3 + $0x1f0] sm:$0xff]  }
  0x6b   : > { %2296 = vmatpush3.bf16.msra.mxu1 %v2490_v49  ;;  %v2508_v49 = vld [vmem:[%s3197_s3 + $0x130] sm:$0xff]  }
  0x6c   : > { %2297 = vmatprep.subr.bf16.mxu1 %v2493_v52  ;;  %v2513_v52 = vld [vmem:[%s3197_s3 + $0x1e8] sm:$0xff]  }
  0x6f   : > { %2298 = vmatpush3.bf16.msra.mxu1 %v2494_v53  ;;  %v2512_v53 = vld [vmem:[%s3197_s3 + $0x128] sm:$0xff]  }
  0x70   : > { %2299 = vmatprep.subr.bf16.mxu1 %v2497_v56  ;;  %v2517_v56 = vld [vmem:[%s3197_s3 + $0x1e0] sm:$0xff]  }
  0x73   : > { %2300 = vmatpush3.bf16.msra.mxu1 %v2498_v57  ;;  %v2516_v57 = vld [vmem:[%s3197_s3 + $0x120] sm:$0xff]  }
  0x74   : > { %2301 = vmatprep.subr.bf16.mxu1 %v2501_v60  ;;  %v2521_v60 = vld [vmem:[%s3197_s3 + $0x1d8] sm:$0xff]  }
  0x77   : > { %2302 = vmatpush3.bf16.msra.mxu1 %v2502_v61  ;;  %v2520_v61 = vld [vmem:[%s3197_s3 + $0x118] sm:$0xff]  }
  0x78   : > { %2331 = vmatprep.subr.bf16.mxu1 %v2505_v63  ;;  %v2522_v63 = vld [vmem:[%s3197_s3 + $0x198] sm:$0xff]  }
  0x91   : > { %v340_v14 = vpop.permute.xlu0 %339 }
  0xf2   : > { %v600_v1 = vpop.f32.mrf.mxu1 }
  0xf3   : > { %v601_v17 = vadd.f32 %v600_v1, %v340_v14  ;;  %v2525_v1 = vld [vmem:[%s3197_s3 + $0x1d0] sm:$0xff]  }
  0xf4   : > { %v602_v2 = vpop.f32.mrf.mxu1  ;;  %v682_v5 = vpop.f32.mrf.mxu0 }
  0xf5   : > { %v683_v16 = vadd.f32 %v682_v5, %v340_v14  ;;  %v603_v19 = vadd.f32 %v602_v2, %v340_v14  ;;  %v730_v26 = vmax.f32 %v601_v17, 0.0  ;;  %v2524_v2 = vld [vmem:[%s3197_s3 + $0x110] sm:$0xff]   ;;  %v2529_v5 = vld [vmem:[%s3197_s3 + $0x1c8] sm:$0xff]  }
  0xf6   : > { %v604_v3 = vpop.f32.mrf.mxu1  ;;  %v684_v7 = vpop.f32.mrf.mxu0  ;;  %v2539_v17 = vld [vmem:[%s3197_s3 + $0x270] sm:$0xff]  }
  0xf7   : > { %v734_v22 = vmax.f32 %v683_v16, 0.0  ;;  %v685_v23 = vadd.f32 %v684_v7, %v340_v14  ;;  %v731_v29 = vmax.f32 %v603_v19, 0.0  ;;  %v2527_v3 = vld [vmem:[%s3197_s3 + $0x148] sm:$0xff]   ;;  %v2538_v19 = vld [vmem:[%s3197_s3 + $0x2b8] sm:$0xff]  }
  0xf8   : > { %v605_v4 = vpop.f32.mrf.mxu1  ;;  %v686_v8 = vpop.f32.mrf.mxu0  ;;  %v2528_v7 = vld [vmem:[%s3197_s3 + $0x108] sm:$0xff]  }
  0xf9   : > { %v735_v31 = vmax.f32 %v685_v23, 0.0  ;;  %v2526_v4 = vld [vmem:[%s3197_s3 + $0x190] sm:$0xff]   ;;  %v2531_v8 = vld [vmem:[%s3197_s3 + $0x140] sm:$0xff]  }
  0xfa   : > { %v687_v9 = vpop.f32.mrf.mxu0  ;;  %v2540_v23 = vld [vmem:[%s3197_s3 + $0x230] sm:$0xff]  }
  0xfb   : > { %v2530_v9 = vld [vmem:[%s3197_s3 + $0x188] sm:$0xff]  }
 0x106   : > { %v641_v10 = vpop.f32.mrf.mxu1 }
 0x107   : > { %v642_v15 = vadd.f32 %v641_v10, %v340_v14  ;;  %v2533_v10 = vld [vmem:[%s3197_s3 + $0x1c0] sm:$0xff]  }
 0x108   : > { %v643_v11 = vpop.f32.mrf.mxu1 }
 0x109   : > { %v644_v18 = vadd.f32 %v643_v11, %v340_v14  ;;  %v732_v21 = vmax.f32 %v642_v15, 0.0  ;;  %v2532_v11 = vld [vmem:[%s3197_s3 + $0x100] sm:$0xff]   ;;  %v2536_v15 = vld [vmem:[%s3197_s3 + $0x238] sm:$0xff]  }
 0x10a   : > { %v645_v12 = vpop.f32.mrf.mxu1 }
 0x10b   : > { %v733_v6 = vmax.f32 %v644_v18, 0.0  ;;  %v738_v0 = vmax.f32 %v730_v26, %v732_v21  ;;  %v2535_v12 = vld [vmem:[%s3197_s3 + $0x278] sm:$0xff]   ;;  %v2541_v21 = vld [vmem:[%s3197_s3 + $0x2f0] sm:$0xff]   ;;  %v2545_v26 = vld [vmem:[%s3197_s3 + $0x2e8] sm:$0xff]  }
 0x10c   : > { %v646_v13 = vpop.f32.mrf.mxu1 }
 0x10d   : > { %v739_v35 = vmax.f32 %v731_v29, %v733_v6  ;;  %v2534_v13 = vld [vmem:[%s3197_s3 + $0x180] sm:$0xff]   ;;  %v2544_v6 = vld [vmem:[%s3197_s3 + $0x228] sm:$0xff]  }
 0x10e   : > { %v2549_v29 = vld [vmem:[%s3197_s3 + $0x2e0] sm:$0xff]  }
 0x11a   : > { %v723_v20 = vpop.f32.mrf.mxu1 }
 0x11b   : > { %v724_v24 = vadd.f32 %v723_v20, %v340_v14 }
 0x11c   : > { %v725_v25 = vpop.f32.mrf.mxu1 }
 0x11d   : > { %v736_v27 = vmax.f32 %v724_v24, 0.0  ;;  %v726_v28 = vadd.f32 %v725_v25, %v340_v14  ;;  %v2537_v14 = vld [vmem:[%s3197_s3 + $0x2f8] sm:$0xff]   ;;  %v2543_v24 = vld [vmem:[%s3197_s3 + $0x268] sm:$0xff]   ;;  %v2542_v25 = vld [vmem:[%s3197_s3 + $0x2b0] sm:$0xff]  }
 0x11e   : > { %v727_v30 = vpop.f32.mrf.mxu1 }
 0x11f   : > { %v740_v32 = vmax.f32 %v734_v22, %v736_v27  ;;  %v737_v33 = vmax.f32 %v726_v28, 0.0  ;;  %v2547_v27 = vld [vmem:[%s3197_s3 + $0x260] sm:$0xff]   ;;  %v2546_v28 = vld [vmem:[%s3197_s3 + $0x2a8] sm:$0xff]  }
 0x120   : > { %v728_v34 = vpop.f32.mrf.mxu1  ;;  %v2548_v30 = vld [vmem:[%s3197_s3 + $0x220] sm:$0xff]  }
 0x121   : > { %v742_v36 = vmax.f32 %v738_v0, %v740_v32  ;;  %v741_v37 = vmax.f32 %v735_v31, %v737_v33  ;;  %v2551_v0 = vld [vmem:[%s3197_s3 + $0x258] sm:$0xff]   ;;  %v2550_v31 = vld [vmem:[%s3197_s3 + $0x2a0] sm:$0xff]   ;;  %v2555_v34 = vld [vmem:[%s3197_s3 + $0x250] sm:$0xff]  }
 0x122   : > { %v2553_v32 = vld [vmem:[%s3197_s3 + $0x2d8] sm:$0xff]  }
 0x123   : > { %v743_v38 = vmax.f32 %v739_v35, %v741_v37  ;;  %v2910_v39 = vpack.c.bf16 %v742_v36, %v742_v36  ;;  %v2552_v33 = vld [vmem:[%s3197_s3 + $0x218] sm:$0xff]   ;;  %v2557_v36 = vld [vmem:[%s3197_s3 + $0x2d0] sm:$0xff]  }
 0x124   : > { %v2554_v35 = vld [vmem:[%s3197_s3 + $0x298] sm:$0xff]   ;;  %v2556_v37 = vld [vmem:[%s3197_s3 + $0x210] sm:$0xff]  }
 0x125   : > { %v2912_v40 = vpack.c.bf16 %v743_v38, %v743_v38  ;;  %v2930_v46 = vshrl.u32 %v2910_v39, 16  ;;  %v1128_v16 = vrot.slane %v2910_v39, 1  ;;  %v2559_v38 = vld [vmem:[%s3197_s3 + $0x248] sm:$0xff]  }
 0x127   : > { %906 = vmatprep.mubr.bf16.mxu0 %v2912_v40  ;;  %v2919_v42 = vshrl.u32 %v2912_v40, 16  ;;  %v1129_v43 = vrot.slane %v2912_v40, 1  ;;  %v1477_v18 = vrot.slane %v2912_v40, 2  ;;  %v1302_v20 = vrot.slane %v2930_v46, 1  ;;  %v2558_v40 = vld [vmem:[%s3197_s3 + $0x290] sm:$0xff]  }
 0x128   : > { %907 = vmatmul.mubr.bf16.vlgmr.msra.gmra.mxu0 %v2910_v39 }
 0x129   : > { %2310 = vmatpush3.bf16.msra.mxu0 %v2504_v41  ;;  %1084 = vmatprep.mubr.bf16.mxu1 %v2919_v42  ;;  %v1303_v48 = vrot.slane %v2919_v42, 1  ;;  %v1651_v22 = vrot.slane %v2919_v42, 2  ;;  %v2561_v41 = vld [vmem:[%s3197_s3 + $0x2c8] sm:$0xff]  }
 0x12a   : > { %1260 = vmatprep.mubr.bf16.mxu0 %v1129_v43  ;;  %1085 = vmatmul.mubr.bf16.vlgmr.msra.gmra.mxu1 %v2930_v46  ;;  %v2560_v42 = vld [vmem:[%s3197_s3 + $0x208] sm:$0xff]   ;;  %v2563_v43 = vld [vmem:[%s3197_s3 + $0x240] sm:$0xff]  }
 0x12b   : > { %2332 = vmatpush3.bf16.msra.mxu1 %v2506_v44  ;;  %2311 = vmatprep.subr.bf16.mxu0 %v2507_v45  ;;  %v2562_v44 = vld [vmem:[%s3197_s3 + $0x288] sm:$0xff]   ;;  %v2565_v45 = vld [vmem:[%s3197_s3 + $0x2c0] sm:$0xff]  }
 0x12c   : > { %1434 = vmatprep.mubr.bf16.mxu1 %v1303_v48  ;;  %2333 = vmatprep.subr.bf16.mxu1 %v2509_v47  ;;  %v2564_v47 = vld [vmem:[%s3197_s3 + $0x200] sm:$0xff]  }
 0x12d   : > { %2312 = vmatpush3.bf16.msra.mxu0 %v2508_v49  ;;  %v2566_v48 = vld [vmem:[%s3197_s3 + $0x280] sm:$0xff]   ;;  %v1476_v49 = vrot.slane %v2910_v39, 2  ;;  %v2569_v39 = vld [vmem:[%s3199_s5 + $0x28] sm:$0xff]  }
 0x12e   : > { %2313 = vmatprep.subr.bf16.mxu0 %v2511_v50  ;;  %v1650_v50 = vrot.slane %v2930_v46, 2  ;;  %v2570_v46 = vld [vmem:[%s3199_s5 + $0x20] sm:$0xff]  }
 0x12f   : > { %2334 = vmatpush3.bf16.msra.mxu1 %v2510_v51  ;;  %v2567_v51 = vld [vmem:[%s3199_s5 + $0x38] sm:$0xff]  }
 0x130   : > { %2335 = vmatprep.subr.bf16.mxu1 %v2513_v52  ;;  %v2639_v52 = vmov 0.0  }
 0x131   : > { %2314 = vmatpush3.bf16.msra.mxu0 %v2512_v53  ;;  %v2568_v53 = vld [vmem:[%s3199_s5 + $0x30] sm:$0xff]  }
 0x132   : > { %2315 = vmatprep.subr.bf16.mxu0 %v2515_v54  ;;  %v2571_v54 = vld [vmem:[%s3199_s5 + $0x18] sm:$0xff]  }
 0x133   : > { %2336 = vmatpush3.bf16.msra.mxu1 %v2514_v55  ;;  %v2572_v55 = vld [vmem:[%s3199_s5 + $0x10] sm:$0xff]  }
 0x134   : > { %2337 = vmatprep.subr.bf16.mxu1 %v2517_v56  ;;  %v2573_v56 = vld [vmem:[%s3199_s5 + $0x8] sm:$0xff]  }
 0x135   : > { %2316 = vmatpush3.bf16.msra.mxu0 %v2516_v57  ;;  %v2574_v57 = vld [vmem:[%s3199_s5] sm:$0xff]  }
 0x136   : > { %2317 = vmatprep.subr.bf16.mxu0 %v2519_v58 }
 0x137   : > { %2338 = vmatpush3.bf16.msra.mxu1 %v2518_v59 }
 0x138   : > { %2339 = vmatprep.subr.bf16.mxu1 %v2521_v60 }
 0x139   : > { %2318 = vmatpush3.bf16.msra.mxu0 %v2520_v61 }
 0x13a   : > { %2319 = vmatprep.subr.bf16.mxu0 %v2523_v62 }
 0x13b   : > { %2340 = vmatpush3.bf16.msra.mxu1 %v2522_v63 }
 0x13c   : > { %2341 = vmatprep.subr.bf16.mxu1 %v2525_v1 }
 0x13d   : > { %2320 = vmatpush3.bf16.msra.mxu0 %v2524_v2 }
 0x13e   : > { %2321 = vmatprep.subr.bf16.mxu0 %v2527_v3 }
 0x13f   : > { %2342 = vmatpush3.bf16.msra.mxu1 %v2526_v4 }
 0x140   : > { %2343 = vmatprep.subr.bf16.mxu1 %v2529_v5 }
 0x141   : > { %2322 = vmatpush3.bf16.msra.mxu0 %v2528_v7 }
 0x142   : > { %2323 = vmatprep.subr.bf16.mxu0 %v2531_v8 }
 0x143   : > { %2344 = vmatpush3.bf16.msra.mxu1 %v2530_v9 }
 0x144   : > { %2345 = vmatprep.subr.bf16.mxu1 %v2533_v10 }
 0x145   : > { %2324 = vmatpush3.bf16.msra.mxu0 %v2532_v11 }
 0x146   : > { %2353 = vmatprep.subr.bf16.mxu0 %v2535_v12 }
 0x147   : > { %2346 = vmatpush3.bf16.msra.mxu1 %v2534_v13  ;;  %v279_v13 = vld [vmem:[%s3198_s4] sm:$0x1] }
 0x148   : > { %1261 = vmatmul.mubr.bf16.vlgmr.msra.gmra.mxu0 %v1128_v16  ;;  %2375 = vmatprep.subr.bf16.mxu1 %v2537_v14 }
 0x149   : > { %2354 = vmatpush3.bf16.msra.mxu0 %v2536_v15  ;;  %1608 = vmatprep.mubr.bf16.mxu0 %v1477_v18 }
 0x14a   : > { %1435 = vmatmul.mubr.bf16.vlgmr.msra.gmra.mxu1 %v1302_v20  ;;  %2355 = vmatprep.subr.bf16.mxu0 %v2539_v17 }
 0x14b   : > { %2376 = vmatpush3.bf16.msra.mxu1 %v2538_v19  ;;  %1782 = vmatprep.mubr.bf16.mxu1 %v1651_v22 }
 0x14c   : > { %2377 = vmatprep.subr.bf16.mxu1 %v2541_v21 }
 0x14d   : > { %2356 = vmatpush3.bf16.msra.mxu0 %v2540_v23 }
 0x14e   : > { %2357 = vmatprep.subr.bf16.mxu0 %v2543_v24 }
 0x14f   : > { %2378 = vmatpush3.bf16.msra.mxu1 %v2542_v25 }
 0x150   : > { %2379 = vmatprep.subr.bf16.mxu1 %v2545_v26 }
 0x151   : > { %2358 = vmatpush3.bf16.msra.mxu0 %v2544_v6 }
 0x152   : > { %2359 = vmatprep.subr.bf16.mxu0 %v2547_v27 }
 0x153   : > { %2380 = vmatpush3.bf16.msra.mxu1 %v2546_v28 }
 0x154   : > { %2381 = vmatprep.subr.bf16.mxu1 %v2549_v29 }
 0x155   : > { %2360 = vmatpush3.bf16.msra.mxu0 %v2548_v30 }
 0x156   : > { %2361 = vmatprep.subr.bf16.mxu0 %v2551_v0 }
 0x157   : > { %2382 = vmatpush3.bf16.msra.mxu1 %v2550_v31 }
 0x158   : > { %2383 = vmatprep.subr.bf16.mxu1 %v2553_v32  ;;  %v296_v32 = vld [vmem:[%s3200_s6] sm:$0x1] }
 0x159   : > { %2362 = vmatpush3.bf16.msra.mxu0 %v2552_v33 }
 0x15a   : > { %2363 = vmatprep.subr.bf16.mxu0 %v2555_v34 }
 0x15b   : > { %2384 = vmatpush3.bf16.msra.mxu1 %v2554_v35 }
 0x15c   : > { %2385 = vmatprep.subr.bf16.mxu1 %v2557_v36 }
 0x15d   : > { %2364 = vmatpush3.bf16.msra.mxu0 %v2556_v37 }
 0x15e   : > { %2365 = vmatprep.subr.bf16.mxu0 %v2559_v38 }
 0x15f   : > { %2386 = vmatpush3.bf16.msra.mxu1 %v2558_v40 }
 0x160   : > { %2387 = vmatprep.subr.bf16.mxu1 %v2561_v41 }
 0x161   : > { %2366 = vmatpush3.bf16.msra.mxu0 %v2560_v42 }
 0x162   : > { %2367 = vmatprep.subr.bf16.mxu0 %v2563_v43 }
 0x163   : > { %2388 = vmatpush3.bf16.msra.mxu1 %v2562_v44 }
 0x164   : > { %2389 = vmatprep.subr.bf16.mxu1 %v2565_v45 }
 0x165   : > { %2368 = vmatpush3.bf16.msra.mxu0 %v2564_v47 }
 0x166   : > { %2406 = vmatprep.subr.bf16.mxu0 %v2639_v52 }
 0x167   : > { %2390 = vmatpush3.bf16.msra.mxu1 %v2566_v48 }
 0x168   : > { %1609 = vmatmul.mubr.bf16.vlgmr.msra.gmra.mxu0 %v1476_v49 }
 0x169   : > { %2407 = vmatpush3.bf16.msra.mxu0 %v2567_v51  ;;  %2422 = vmatprep.mubr.msk.bf16.mxu0 %vm2640_vm3, %v2639_v52 }
 0x16a   : > { %1783 = vmatmul.mubr.bf16.vlgmr.msra.gmra.mxu1 %v1650_v50  ;;  %2408 = vmatprep.subr.bf16.mxu0 %v2639_v52 }
 0x16d   : > { %2409 = vmatpush3.bf16.msra.mxu0 %v2568_v53 }
 0x16e   : > { %2410 = vmatprep.subr.bf16.mxu0 %v2639_v52 }
 0x171   : > { %2411 = vmatpush3.bf16.msra.mxu0 %v2569_v39 }
 0x172   : > { %2412 = vmatprep.subr.bf16.mxu0 %v2639_v52 }
 0x175   : > { %2413 = vmatpush3.bf16.msra.mxu0 %v2570_v46 }
 0x176   : > { %2414 = vmatprep.subr.bf16.mxu0 %v2639_v52 }
 0x179   : > { %2415 = vmatpush3.bf16.msra.mxu0 %v2571_v54 }
 0x17a   : > { %2416 = vmatprep.subr.bf16.mxu0 %v2639_v52 }
 0x17d   : > { %2417 = vmatpush3.bf16.msra.mxu0 %v2572_v55 }
 0x17e   : > { %2418 = vmatprep.subr.bf16.mxu0 %v2639_v52 }
 0x181   : > { %2419 = vmatpush3.bf16.msra.mxu0 %v2573_v56 }
 0x182   : > { %2420 = vmatprep.subr.bf16.mxu0 %v2639_v52 }
 0x185   : > { %2421 = vmatpush3.bf16.msra.mxu0 %v2574_v57 }
 0x1e8   : > { %v2281_v58 = vpop.f32.mrf.mxu0 }
 0x1ea   : > { %v2282_v59 = vpop.f32.mrf.mxu0  ;;  %v2303_v60 = vpop.f32.mrf.mxu1 }
 0x1eb   : > { %v2283_v12 = vadd.f32 %v2282_v59, %v2281_v58 }
 0x1ec   : > { %v2284_v61 = vpop.f32.mrf.mxu0  ;;  %v2304_v62 = vpop.f32.mrf.mxu1 }
 0x1ed   : > { %v914_v14 = vadd.f32 %v2283_v12, %v279_v13  ;;  %v2305_v15 = vadd.f32 %v2304_v62, %v2303_v60 }
 0x1ee   : > { %v2285_v63 = vpop.f32.mrf.mxu0  ;;  %v2306_v1 = vpop.f32.mrf.mxu1 }
 0x1ef   : > { %v1092_v17 = vadd.f32 %v2305_v15, %v914_v14 }
 0x1f0   : > { %v2307_v2 = vpop.f32.mrf.mxu1 }
 0x208   : > { %v2325_v3 = vpop.f32.mrf.mxu0 }
 0x20a   : > { %v2326_v4 = vpop.f32.mrf.mxu0  ;;  %v2347_v5 = vpop.f32.mrf.mxu1 }
 0x20b   : > { %v2327_v16 = vadd.f32 %v2326_v4, %v2325_v3 }
 0x20c   : > { %v2328_v7 = vpop.f32.mrf.mxu0  ;;  %v2348_v8 = vpop.f32.mrf.mxu1 }
 0x20d   : > { %v1268_v18 = vadd.f32 %v2327_v16, %v1092_v17  ;;  %v2349_v19 = vadd.f32 %v2348_v8, %v2347_v5 }
 0x20e   : > { %v2329_v9 = vpop.f32.mrf.mxu0  ;;  %v2350_v10 = vpop.f32.mrf.mxu1 }
 0x20f   : > { %v1442_v23 = vadd.f32 %v2349_v19, %v1268_v18 }
 0x210   : > { %v2351_v11 = vpop.f32.mrf.mxu1 }
 0x228   : > { %v2369_v20 = vpop.f32.mrf.mxu0 }
 0x22a   : > { %v2370_v21 = vpop.f32.mrf.mxu0  ;;  %v2391_v22 = vpop.f32.mrf.mxu1 }
 0x22b   : > { %v2371_v24 = vadd.f32 %v2370_v21, %v2369_v20 }
 0x22c   : > { %v2372_v25 = vpop.f32.mrf.mxu0  ;;  %v2392_v26 = vpop.f32.mrf.mxu1 }
 0x22d   : > { %v1616_v6 = vadd.f32 %v2371_v24, %v1442_v23  ;;  %v2393_v27 = vadd.f32 %v2392_v26, %v2391_v22 }
 0x22e   : > { %v2373_v28 = vpop.f32.mrf.mxu0  ;;  %v2394_v29 = vpop.f32.mrf.mxu1 }
 0x22f   : > { %v1790_v30 = vadd.f32 %v2393_v27, %v1616_v6 }
 0x230   : > { %v2395_v0 = vpop.f32.mrf.mxu1 }
 0x231   : > { %v1791_v31 = vpack.c.bf16 %v1790_v30, %v1790_v30 }
 0x233   : > { %2423 = vmatmul.mubr.bf16.vlgmr.msra.gmra.mxu0 %v1791_v31 }
 0x2f3   : > { %v1874_v33 = vpop.f32.mrf.mxu0 }
 0x2f4   : > { %v1875_v34 = vadd.f32 %v1874_v33, %v296_v32 }
 0x2f5   : > { %v2424_v35 = vpop.f32.mrf.mxu0 }
 0x2f6   : > { %1880 = vst [vmem:[%s270_s9] sm:$0x1] %v1875_v34 }
 0x2f7   : > { %v1877_v36 = vpop.f32.mrf.mxu0 }
 0x2f8   : > { %2588 = shalt.err (!%p2585_p3)
}
 0x2f9   : > { %s2589_s21 = scalar_lea.hbm %s3153_s16, 16  ;;  %s2593_s29 = scalar_lea.hbm %s3201_s7, 32 }
 0x2fa   : > { %p2590_p4 = scmp.ne.s32.totalorder %s3153_s16, %s2589_s21  ;;  %p2594_p9 = scmp.lt.s32.totalorder %s3153_s16, %s3201_s7 }
 0x2fb   : > { %p2595_p10 = scmp.lt.s32.totalorder %s2593_s29, %s2589_s21 }
 0x2fc   : > { %p2591_p7 = pnand %p2590_p4, %p2720_p5 }
 0x2fd   : > { %p2596_p11 = por %p2595_p10, %p2594_p9 }
 0x2fe   : > { %p2592_p8 = pneg %p2591_p7 }
 0x300   : > { %p2597_p12 = pnand %p2596_p11, %p2592_p8 }
 0x302   : > { %2600 = shalt.err (!%p2597_p12)
}
 0x303   : > { %2427 = dma.vmem_to_hbm [thread:$0]  (%p2720_p5), %s3155_s13, 16, %s3153_s16, %s1882_s17   ;;  %v2425_v37 = vpop.f32.mrf.mxu0 }
 0x304 PF: > { %p2433_p13 = scmp.ge.s32.totalorder %s2635_s27, 2  ;;  %s1906_s14 = sand.u32 1, %s2623_s24  }
 0x305   : > { %s1907_s15 = scalar_lea.sflag [#allocation3], %s1906_s14 }
 0x306   : > { %p2430_p0 = pnand %p2433_p13, %p2724_p6 }
 0x308   : > { %p2431_p1 = pneg %p2430_p0 }
 0x30a   : > { %2618 = dma.done.wait (%p2431_p1), %s1907_s15, 16  }
 0x30b   : > { %2620 = vsyncadd (%p2431_p1), %s1907_s15, 4294967280  ;;  %p17_p2 = scmp.ge.s32.totalorder %s2707_s30, 4   ;;  %s3204_s24 = smov %s2627_s25 }
 0x30c   : > { %s3205_s25 = smov %s2631_s26  ;;  %s3206_s26 = smov %s2718_s10 }
 0x30d   : > { %s3207_s27 = smov %s2707_s30  ;;  %19 = sbr.rel (!%p17_p2) target bundleno = 3 (0x3), region = 88 }
 0x312   :  { %1911 = vsyncpa [#allocation3], 1 }
 0x313   :  { %1913 = vsyncpa [#allocation3 + $0x1], 1 }

</bundles_post_ra>
